<compile_context>
chip_gen: v5e
topology: v5e:2x2
jax: 0.10.0
libtpu: 0.0.40
codegen_flags: <defaults>
</compile_context>

<pallas_src>
import functools

import jax
import jax.numpy as jnp
from jax import lax
from jax.experimental import pallas as pl
from jax.experimental.pallas import tpu as pltpu


def _wce_kernel(pred_ref, tgt_ref, count_ref, nll_ref, valid_ref, *,
                ignore_index, hw, tile_hw, needs_mask):
    """Per-(batch, pixel-tile) partial sums.

    pred_ref : (C, T)  logits tile (caller dtype), classes on sublanes,
                       pixels on lanes.
    tgt_ref  : (1, T)  int32 labels tile (lane-dense).
    count_ref: (C, 1)  int32 per-class pixel count  (accumulated over tiles).
    nll_ref  : (C, 1)  f32   per-class sum of -log_softmax at target.
    valid_ref: (C, 1)  f32   per-class count of non-ignored pixels.
    """
    t = pl.program_id(1)

    @pl.when(t == 0)
    def _():
        count_ref[...] = jnp.zeros_like(count_ref)
        nll_ref[...] = jnp.zeros_like(nll_ref)
        valid_ref[...] = jnp.zeros_like(valid_ref)

    logits = pred_ref[...].astype(jnp.float32)            # (C, T) f32
    tgt = tgt_ref[...]                                     # (1, T) i32

    class_ids = lax.broadcasted_iota(jnp.int32, logits.shape, 0)   # (C, T)
    onehot_b = class_ids == tgt                                    # (C, T) bool
    valid_b = tgt != ignore_index                                  # (1, T) bool

    if needs_mask:
        # Ragged last tile: pixels past H*W carry garbage logits/labels.
        pix = lax.broadcasted_iota(jnp.int32, tgt.shape, 1) + t * tile_hw
        in_bounds = pix < hw                                       # (1, T)
        onehot_b = onehot_b & in_bounds
        valid_b = valid_b & in_bounds

    onehot = onehot_b.astype(jnp.float32)                          # (C, T)
    valid = valid_b.astype(jnp.float32)                            # (1, T)

    # Numerically stable log-softmax NLL at the target class.
    # Class reductions are sublane (axis=0) reductions.
    m = jnp.max(logits, axis=0, keepdims=True)                     # (1, T)
    lse = m + jnp.log(jnp.sum(jnp.exp(logits - m), axis=0, keepdims=True))
    logit_t = jnp.sum(logits * onehot, axis=0, keepdims=True)      # (1, T)
    nll = lse - logit_t                                            # (1, T)
    if needs_mask:
        nll = jnp.where(in_bounds, nll, 0.0)   # kill NaN/Inf from garbage tail

    # Per-class accumulators: lane (axis=1) reductions -> (C, 1).
    count_ref[...] += jnp.sum(onehot, axis=1, keepdims=True).astype(jnp.int32)
    nll_ref[...] += jnp.sum(onehot * (nll * valid), axis=1, keepdims=True)
    valid_ref[...] += jnp.sum(onehot * valid, axis=1, keepdims=True)


def weighted_cross_entropy(prediction, target, often_weight_prev, *,
                           ignore_index, num_classes, max_value=7,
                           tile_hw=8192):
    """Forward of WeightedCrossEntropy.

    prediction: (N, C, H, W) logits in the caller's dtype (f32 or bf16).
    target:     (N, H, W) integer labels.
    often_weight_prev: (C,) module state (ones on the first call).
    Returns the scalar loss.  (The updated often_weight / class_weight state
    is `0.9*often_weight_prev + 0.1*often` / `weight*often_w` as computed
    below, should the caller want to thread it.)
    """
    n, c, h, w = prediction.shape
    assert c == num_classes
    hw = h * w

    # Free reshapes only — no transpose, no dtype change on the big tensor.
    pred3 = prediction.reshape(n, c, hw)                   # (N, C, HW)
    tgt3 = target.reshape(n, 1, hw).astype(jnp.int32)      # (N, 1, HW)

    tile = min(tile_hw, hw)
    if tile < hw:
        tile = max(128, (tile // 128) * 128)   # lane-aligned pixel tile
    num_tiles = (hw + tile - 1) // tile
    needs_mask = (hw % tile) != 0

    kernel = functools.partial(_wce_kernel, ignore_index=ignore_index,
                               hw=hw, tile_hw=tile, needs_mask=needs_mask)

    out_block = pl.BlockSpec((None, c, 1), lambda b, t: (b, 0, 0))
    count_o, nll_o, valid_o = pl.pallas_call(
        kernel,
        out_shape=(jax.ShapeDtypeStruct((n, c, 1), jnp.int32),
                   jax.ShapeDtypeStruct((n, c, 1), jnp.float32),
                   jax.ShapeDtypeStruct((n, c, 1), jnp.float32)),
        grid_spec=pltpu.PrefetchScalarGridSpec(
            num_scalar_prefetch=0,
            grid=(n, num_tiles),
            in_specs=[
                pl.BlockSpec((None, c, tile), lambda b, t: (b, 0, t)),  # logits
                pl.BlockSpec((None, 1, tile), lambda b, t: (b, 0, t)),  # labels
            ],
            out_specs=[out_block, out_block, out_block],
        ),
        compiler_params=pltpu.CompilerParams(
            dimension_semantics=("parallel", "arbitrary"),
            vmem_limit_bytes=40 * 1024 * 1024),
    )(pred3, tgt3)

    # Tiny (N, C) epilogue in plain JAX: weighting + normalization.
    count = jnp.sum(count_o[:, :, 0], axis=0)              # (C,) int32, exact
    nll_sum = jnp.sum(nll_o[:, :, 0], axis=0)              # (C,) f32
    valid_cnt = jnp.sum(valid_o[:, :, 0], axis=0)          # (C,) f32

    weight = jnp.where(count < 64 * 64 * n, float(max_value), 1.0)
    often = jnp.where(count == 0, float(max_value), 1.0)
    often_w = 0.9 * often_weight_prev.astype(jnp.float32) + 0.1 * often
    class_w = weight * often_w
    loss = jnp.sum(class_w * nll_sum) / jnp.sum(class_w * valid_cnt)
    return loss


def _reference(prediction, target, often_prev, ignore_index, num_classes,
               max_value=7):
    """Pure-JAX reference mirroring the PyTorch forward (NCHW)."""
    n = prediction.shape[0]
    count = jnp.stack([jnp.sum(target == i).astype(jnp.float32)
                       for i in range(num_classes)])
    weight = jnp.where(count < 64 * 64 * n, float(max_value), 1.0)
    often = jnp.where(count == 0, float(max_value), 1.0)
    often_w = 0.9 * often_prev + 0.1 * often
    class_w = weight * often_w
    logp = jax.nn.log_softmax(prediction.astype(jnp.float32), axis=1)
    tgt_c = jnp.clip(target, 0, num_classes - 1)
    logp_t = jnp.take_along_axis(logp, tgt_c[:, None], axis=1)[:, 0]
    valid = (target != ignore_index).astype(jnp.float32)
    w_pix = class_w[tgt_c] * valid
    return -jnp.sum(w_pix * logp_t) / jnp.sum(w_pix)


if __name__ == "__main__":
    n, c, h, w = 2, 4, 16, 16
    ignore_index = 255

    key = jax.random.PRNGKey(0)
    k1, k2 = jax.random.split(key)
    prediction = jax.random.normal(k1, (n, c, h, w), dtype=jnp.float32)
    raw = jax.random.randint(k2, (n, h, w), 0, c + 1)
    target = jnp.where(raw == c, ignore_index, raw).astype(jnp.int32)

    # module __init__ state: often_weight = ones(num_classes)
    often_prev = jnp.ones((c,), jnp.float32)

    loss = weighted_cross_entropy(prediction, target, often_prev,
                                  ignore_index=ignore_index, num_classes=c)
    loss = jax.block_until_ready(loss)

    ref = _reference(prediction, target, often_prev, ignore_index, c)
    assert jnp.allclose(loss, ref, rtol=1e-4, atol=1e-5), (loss, ref)
    print("KERNEL_OK")
</pallas_src>

<mosaic_0001>
module attributes {stable_mosaic.version = 11 : i64} {
  func.func @_wce_kernel(%arg0: i32, %arg1: i32, %arg2: memref<1x4x256xf32, #tpu.memory_space<vmem>>, %arg3: memref<1x1x256xi32, #tpu.memory_space<vmem>>, %arg4: memref<1x4x1xi32, #tpu.memory_space<vmem>>, %arg5: memref<1x4x1xf32, #tpu.memory_space<vmem>>, %arg6: memref<1x4x1xf32, #tpu.memory_space<vmem>>) attributes {dimension_semantics = [#tpu.dimension_semantics<parallel>, #tpu.dimension_semantics<arbitrary>], iteration_bounds = array<i64: 2, 1>, scalar_prefetch = 0 : i64, scratch_operands = 0 : i64, tpu.core_type = #tpu.core_type<tc>, window_params = [{transform_indices = @transform_0, window_bounds = array<i64: 1, 4, 256>}, {transform_indices = @transform_1, window_bounds = array<i64: 1, 1, 256>}, {transform_indices = @transform_2, window_bounds = array<i64: 1, 4, 1>}, {transform_indices = @transform_3, window_bounds = array<i64: 1, 4, 1>}, {transform_indices = @transform_4, window_bounds = array<i64: 1, 4, 1>}]} {
    %c0_i32 = arith.constant 0 : i32
    %0 = arith.cmpi eq, %arg1, %c0_i32 : i32
    %1 = arith.extui %0 : i1 to i32
    %c0_i32_0 = arith.constant 0 : i32
    %2 = arith.cmpi ne, %1, %c0_i32_0 : i32
    scf.if %2 {
      %c0_i32_29 = arith.constant 0 : i32
      %59 = vector.broadcast %c0_i32_29 : i32 to vector<4x1xi32>
      %c0_30 = arith.constant 0 : index
      %c0_31 = arith.constant 0 : index
      %c0_32 = arith.constant 0 : index
      %60 = vector.load %arg4[%c0_30, %c0_31, %c0_32] : memref<1x4x1xi32, #tpu.memory_space<vmem>>, vector<1x4x1xi32>
      %61 = vector.shape_cast %60 : vector<1x4x1xi32> to vector<4x1xi32>
      %62 = vector.shape_cast %59 : vector<4x1xi32> to vector<1x4x1xi32>
      tpu.vector_store %arg4[%c0_30, %c0_31, %c0_32], %62 {strides = array<i32>} : memref<1x4x1xi32, #tpu.memory_space<vmem>>, vector<1x4x1xi32>,
      %cst_33 = arith.constant 0.000000e+00 : f32
      %63 = vector.broadcast %cst_33 : f32 to vector<4x1xf32>
      %c0_34 = arith.constant 0 : index
      %c0_35 = arith.constant 0 : index
      %c0_36 = arith.constant 0 : index
      %64 = vector.load %arg5[%c0_34, %c0_35, %c0_36] : memref<1x4x1xf32, #tpu.memory_space<vmem>>, vector<1x4x1xf32>
      %65 = vector.shape_cast %64 : vector<1x4x1xf32> to vector<4x1xf32>
      %66 = vector.shape_cast %63 : vector<4x1xf32> to vector<1x4x1xf32>
      tpu.vector_store %arg5[%c0_34, %c0_35, %c0_36], %66 {strides = array<i32>} : memref<1x4x1xf32, #tpu.memory_space<vmem>>, vector<1x4x1xf32>,
      %cst_37 = arith.constant 0.000000e+00 : f32
      %67 = vector.broadcast %cst_37 : f32 to vector<4x1xf32>
      %c0_38 = arith.constant 0 : index
      %c0_39 = arith.constant 0 : index
      %c0_40 = arith.constant 0 : index
      %68 = vector.load %arg6[%c0_38, %c0_39, %c0_40] : memref<1x4x1xf32, #tpu.memory_space<vmem>>, vector<1x4x1xf32>
      %69 = vector.shape_cast %68 : vector<1x4x1xf32> to vector<4x1xf32>
      %70 = vector.shape_cast %67 : vector<4x1xf32> to vector<1x4x1xf32>
      tpu.vector_store %arg6[%c0_38, %c0_39, %c0_40], %70 {strides = array<i32>} : memref<1x4x1xf32, #tpu.memory_space<vmem>>, vector<1x4x1xf32>,
    } else {
    }
    %c0 = arith.constant 0 : index
    %c0_1 = arith.constant 0 : index
    %c0_2 = arith.constant 0 : index
    %3 = vector.load %arg2[%c0, %c0_1, %c0_2] : memref<1x4x256xf32, #tpu.memory_space<vmem>>, vector<1x4x256xf32>
    %4 = vector.shape_cast %3 : vector<1x4x256xf32> to vector<4x256xf32>
    %c0_3 = arith.constant 0 : index
    %c0_4 = arith.constant 0 : index
    %c0_5 = arith.constant 0 : index
    %5 = vector.load %arg3[%c0_3, %c0_4, %c0_5] : memref<1x1x256xi32, #tpu.memory_space<vmem>>, vector<1x1x256xi32>
    %6 = vector.shape_cast %5 : vector<1x1x256xi32> to vector<1x256xi32>
    %7 = tpu.iota {dimensions = array<i32: 0>} : vector<4x256xi32>
    %8 = vector.broadcast %6 : vector<1x256xi32> to vector<4x256xi32>
    %9 = arith.cmpi eq, %7, %8 : vector<4x256xi32>
    %c255_i32 = arith.constant 255 : i32
    %10 = vector.broadcast %c255_i32 : i32 to vector<1x256xi32>
    %11 = arith.cmpi ne, %6, %10 : vector<1x256xi32>
    %12 = arith.extui %9 : vector<4x256xi1> to vector<4x256xi32>
    %13 = arith.sitofp %12 : vector<4x256xi32> to vector<4x256xf32>
    %14 = arith.extui %11 : vector<1x256xi1> to vector<1x256xi32>
    %15 = arith.sitofp %14 : vector<1x256xi32> to vector<1x256xf32>
    %cst = arith.constant dense<0xFF800000> : vector<256xf32>
    %16 = vector.multi_reduction <maximumf>, %4, %cst [0] : vector<4x256xf32> to vector<256xf32>
    %17 = vector.shape_cast %16 : vector<256xf32> to vector<1x256xf32>
    %18 = vector.broadcast %17 : vector<1x256xf32> to vector<4x256xf32>
    %19 = arith.subf %4, %18 : vector<4x256xf32>
    %20 = math.exp %19 : vector<4x256xf32>
    %cst_6 = arith.constant dense<0.000000e+00> : vector<256xf32>
    %21 = vector.multi_reduction <add>, %20, %cst_6 [0] : vector<4x256xf32> to vector<256xf32>
    %22 = vector.shape_cast %21 : vector<256xf32> to vector<1x256xf32>
    %23 = math.log %22 : vector<1x256xf32>
    %24 = arith.addf %17, %23 : vector<1x256xf32>
    %25 = arith.mulf %4, %13 : vector<4x256xf32>
    %cst_7 = arith.constant dense<0.000000e+00> : vector<256xf32>
    %26 = vector.multi_reduction <add>, %25, %cst_7 [0] : vector<4x256xf32> to vector<256xf32>
    %27 = vector.shape_cast %26 : vector<256xf32> to vector<1x256xf32>
    %28 = arith.subf %24, %27 : vector<1x256xf32>
    %c0_8 = arith.constant 0 : index
    %c0_9 = arith.constant 0 : index
    %c0_10 = arith.constant 0 : index
    %29 = vector.load %arg4[%c0_8, %c0_9, %c0_10] : memref<1x4x1xi32, #tpu.memory_space<vmem>>, vector<1x4x1xi32>
    %30 = vector.shape_cast %29 : vector<1x4x1xi32> to vector<4x1xi32>
    %cst_11 = arith.constant dense<0.000000e+00> : vector<4xf32>
    %31 = vector.multi_reduction <add>, %13, %cst_11 [1] : vector<4x256xf32> to vector<4xf32>
    %32 = vector.shape_cast %31 : vector<4xf32> to vector<4x1xf32>
    %33 = arith.fptosi %32 : vector<4x1xf32> to vector<4x1xi32>
    %34 = arith.addi %30, %33 : vector<4x1xi32>
    %c0_12 = arith.constant 0 : index
    %c0_13 = arith.constant 0 : index
    %c0_14 = arith.constant 0 : index
    %35 = vector.load %arg4[%c0_12, %c0_13, %c0_14] : memref<1x4x1xi32, #tpu.memory_space<vmem>>, vector<1x4x1xi32>
    %36 = vector.shape_cast %35 : vector<1x4x1xi32> to vector<4x1xi32>
    %37 = vector.shape_cast %34 : vector<4x1xi32> to vector<1x4x1xi32>
    tpu.vector_store %arg4[%c0_12, %c0_13, %c0_14], %37 {strides = array<i32>} : memref<1x4x1xi32, #tpu.memory_space<vmem>>, vector<1x4x1xi32>,
    %c0_15 = arith.constant 0 : index
    %c0_16 = arith.constant 0 : index
    %c0_17 = arith.constant 0 : index
    %38 = vector.load %arg5[%c0_15, %c0_16, %c0_17] : memref<1x4x1xf32, #tpu.memory_space<vmem>>, vector<1x4x1xf32>
    %39 = vector.shape_cast %38 : vector<1x4x1xf32> to vector<4x1xf32>
    %40 = arith.mulf %28, %15 : vector<1x256xf32>
    %41 = vector.broadcast %40 : vector<1x256xf32> to vector<4x256xf32>
    %42 = arith.mulf %13, %41 : vector<4x256xf32>
    %cst_18 = arith.constant dense<0.000000e+00> : vector<4xf32>
    %43 = vector.multi_reduction <add>, %42, %cst_18 [1] : vector<4x256xf32> to vector<4xf32>
    %44 = vector.shape_cast %43 : vector<4xf32> to vector<4x1xf32>
    %45 = arith.addf %39, %44 : vector<4x1xf32>
    %c0_19 = arith.constant 0 : index
    %c0_20 = arith.constant 0 : index
    %c0_21 = arith.constant 0 : index
    %46 = vector.load %arg5[%c0_19, %c0_20, %c0_21] : memref<1x4x1xf32, #tpu.memory_space<vmem>>, vector<1x4x1xf32>
    %47 = vector.shape_cast %46 : vector<1x4x1xf32> to vector<4x1xf32>
    %48 = vector.shape_cast %45 : vector<4x1xf32> to vector<1x4x1xf32>
    tpu.vector_store %arg5[%c0_19, %c0_20, %c0_21], %48 {strides = array<i32>} : memref<1x4x1xf32, #tpu.memory_space<vmem>>, vector<1x4x1xf32>,
    %c0_22 = arith.constant 0 : index
    %c0_23 = arith.constant 0 : index
    %c0_24 = arith.constant 0 : index
    %49 = vector.load %arg6[%c0_22, %c0_23, %c0_24] : memref<1x4x1xf32, #tpu.memory_space<vmem>>, vector<1x4x1xf32>
    %50 = vector.shape_cast %49 : vector<1x4x1xf32> to vector<4x1xf32>
    %51 = vector.broadcast %15 : vector<1x256xf32> to vector<4x256xf32>
    %52 = arith.mulf %13, %51 : vector<4x256xf32>
    %cst_25 = arith.constant dense<0.000000e+00> : vector<4xf32>
    %53 = vector.multi_reduction <add>, %52, %cst_25 [1] : vector<4x256xf32> to vector<4xf32>
    %54 = vector.shape_cast %53 : vector<4xf32> to vector<4x1xf32>
    %55 = arith.addf %50, %54 : vector<4x1xf32>
    %c0_26 = arith.constant 0 : index
    %c0_27 = arith.constant 0 : index
    %c0_28 = arith.constant 0 : index
    %56 = vector.load %arg6[%c0_26, %c0_27, %c0_28] : memref<1x4x1xf32, #tpu.memory_space<vmem>>, vector<1x4x1xf32>
    %57 = vector.shape_cast %56 : vector<1x4x1xf32> to vector<4x1xf32>
    %58 = vector.shape_cast %55 : vector<4x1xf32> to vector<1x4x1xf32>
    tpu.vector_store %arg6[%c0_26, %c0_27, %c0_28], %58 {strides = array<i32>} : memref<1x4x1xf32, #tpu.memory_space<vmem>>, vector<1x4x1xf32>,
    return
  }
  func.func @transform_0(%arg0: i32, %arg1: i32) -> (i32, i32, i32) {
    %c0_i32 = arith.constant 0 : i32
    %c0_i32_0 = arith.constant 0 : i32
    return %arg0, %c0_i32, %arg1 : i32, i32, i32
  }
  func.func @transform_1(%arg0: i32, %arg1: i32) -> (i32, i32, i32) {
    %c0_i32 = arith.constant 0 : i32
    %c0_i32_0 = arith.constant 0 : i32
    return %arg0, %c0_i32, %arg1 : i32, i32, i32
  }
  func.func @transform_2(%arg0: i32, %arg1: i32) -> (i32, i32, i32) {
    %c0_i32 = arith.constant 0 : i32
    %c0_i32_0 = arith.constant 0 : i32
    %c0_i32_1 = arith.constant 0 : i32
    return %arg0, %c0_i32, %c0_i32_0 : i32, i32, i32
  }
  func.func @transform_3(%arg0: i32, %arg1: i32) -> (i32, i32, i32) {
    %c0_i32 = arith.constant 0 : i32
    %c0_i32_0 = arith.constant 0 : i32
    %c0_i32_1 = arith.constant 0 : i32
    return %arg0, %c0_i32, %c0_i32_0 : i32, i32, i32
  }
  func.func @transform_4(%arg0: i32, %arg1: i32) -> (i32, i32, i32) {
    %c0_i32 = arith.constant 0 : i32
    %c0_i32_0 = arith.constant 0 : i32
    %c0_i32_1 = arith.constant 0 : i32
    return %arg0, %c0_i32, %c0_i32_0 : i32, i32, i32
  }
}

</mosaic_0001>

<bundles_post_ra>
// kernel: tpu_custom_call.1
= control target key start
LH: loop header
LB: loop body
LE: loop exit
PB: predicated region body
PF: predicated region fallthrough
CT: control target
= control target key end

     0   :  { %10 = vsyncpa [#allocation3], 0  ;;  %s1002_s0 = inlined_call_operand.hbm [shape: f32[2,4,256], index: 0, kind: input, shape index: {}]   ;;  %s1003_s1 = inlined_call_operand.hbm [shape: s32[2,1,256], index: 1, kind: input, shape index: {}]   ;;  %s1004_s2 = inlined_call_operand.vmem [shape: s32[2,4,1], index: 2, kind: output, shape index: {0}]   ;;  %s1005_s3 = inlined_call_operand.vmem [shape: f32[2,4,1], index: 3, kind: output, shape index: {1}]   ;;  %s1006_s4 = inlined_call_operand.vmem [shape: f32[2,4,1], index: 4, kind: output, shape index: {2}]  }
   0x1   :  { %12 = vsyncpa [#allocation3 + $0x1], 0 }
   0x2   :  { %13 = vsyncpa [#allocation5], 0 }
   0x3   :  { %15 = vsyncpa [#allocation5 + $0x1], 0  ;;  %s843_s15 = smov 0   ;;  %s845_s16 = smov 0  }
   0x4   :  { %s847_s17 = smov 0   ;;  %s849_s18 = smov 0  }
   0x5   :  { %s851_s19 = smov 0   ;;  %s853_s20 = smov 0  }
   0x6 LB: > { %s606_s21 = sadd.s32 4294967295, %s814_s20   ;;  %s33_s22 = sadd.s32 1, %s810_s19  ;;  %s814_s20 = sphi %s853_s20, %s21_s20   ;;  %s810_s19 = sphi %s851_s19, %s1014_s19   ;;  %s806_s18 = sphi %s849_s18, %s1013_s18   ;;  %s802_s17 = sphi %s847_s17, %s1012_s17   ;;  %s798_s16 = sphi %s845_s16, %s1011_s16   ;;  %s794_s15 = sphi %s843_s15, %s1010_s15  }
   0x7   : > { %p35_p0 = scmp.ge.s32.totalorder %s33_s22, 2  ;;  %s42_s23 = sadd.s32 1, %s802_s17 }
   0x8   : > { %p49_p1 = scmp.ne.s32.totalorder %s802_s17, %s798_s16  ;;  %p50_p2 = scmp.eq.s32.totalorder %s814_s20, 0 }
   0x9   : > { %s1016_s22 = smov (%p35_p0, %s33_s22), 0  ;;  %p55_p4 = scmp.ne.s32.totalorder %s798_s16, %s794_s15 }
   0xa   : > { %p879_p3 = por %p50_p2, %p49_p1  ;;  %s37_s25 = ssub.s32 %s810_s19, %s1016_s22 }
   0xb   : > { %p56_p5 = scmp.eq.s32.totalorder %s606_s21, 0  ;;  %p40_p6 = scmp.eq.s32.totalorder %s37_s25, 0 }
   0xc   : > { %p643_p8 = scmp.lt.s32.totalorder %s814_s20, 2  ;;  %s185_s28 = sand.u32 1, %s802_s17  }
   0xd   : > { %p886_p7 = por %p56_p5, %p55_p4  ;;  %s626_s29 = sshll.u32 %s810_s19, 3 }
   0xe   : > { %s892_s27 = scalar_select %p40_p6, %s802_s17, %s42_s23  }
   0xf   : > { %s610_s30 = sshll.u32 %s185_s28, 3  ;;  %s196_s7 = scalar_lea.hbm %s1002_s0, %s626_s29 }
  0x10   : > { %s198_s8 = sshll.u32 %s196_s7, 4  ;;  %s189_s9 = scalar_lea.vmem [#allocation2], %s610_s30  ;;  %s199_s8 = int_to_ptr.hbm [resolvable:$true] %s198_s8 }
  0x11   : > { %s200_s10 = sshll.u32 %s189_s9, 4  ;;  %p901_p9 = pnand %p643_p8, %p879_p3  ;;  %s201_s10 = int_to_ptr.vmem [resolvable:$true] %s200_s10 }
  0x12   : > { %p615_p10 = scmp.ge.s32.totalorder %s814_s20, 1  ;;  %p226_p11 = scmp.lt.s32.totalorder %s814_s20, 3 }
  0x13   : > { %s613_s12 = sshll.u32 %s185_s28, 1  ;;  %s186_s13 = scalar_lea.sflag [#allocation3], %s185_s28 }
  0x14   : > { %639 = dma.hbm_to_vmem [thread:$0]  (!%p901_p9), %s199_s8, 128, %s201_s10, %s186_s13  }
  0x15   : > { %p227_p12 = pnand %p615_p10, %p226_p11  ;;  %s614_s14 = sshll.u32 %s810_s19, 1 }
  0x16   : > { %s211_s15 = scalar_lea.vmem [#allocation4], %s613_s12  ;;  %s217_s24 = scalar_lea.hbm %s1003_s1, %s614_s14 }
  0x17   : > { %s221_s21 = sshll.u32 %s211_s15, 4  ;;  %s219_s29 = sshll.u32 %s217_s24, 4  ;;  %s222_s21 = int_to_ptr.vmem [resolvable:$true] %s221_s21  ;;  %s220_s29 = int_to_ptr.hbm [resolvable:$true] %s219_s29 }
  0x18   : > { %s208_s30 = scalar_lea.sflag [#allocation5], %s185_s28  ;;  %230 = sbr.rel (%p227_p12) target bundleno = 233 (0xe9), region = 28 }
  0x19   : > { %642 = dma.hbm_to_vmem [thread:$0]  (!%p901_p9), %s220_s29, 32, %s222_s21, %s208_s30  }
  0x1a   : > { %s232_s5 = sand.u32 (!%p227_p12), 1, %s798_s16  }
  0x1b   : > { %s616_s6 = sshll.u32 (!%p227_p12), %s232_s5, 3  ;;  %s233_s7 = scalar_lea.sflag (!%p227_p12), [#allocation3], %s232_s5 }
  0x1c   : > { %s236_s8 = scalar_lea.vmem (!%p227_p12), [#allocation2], %s616_s6 }
  0x1d   : > { %785 = dma.done.wait (%p886_p7), %s233_s7, 128  }
  0x1e   : > { %787 = vsyncadd (%p886_p7), %s233_s7, 4294967168  ;;  %s617_s9 = sshll.u32 %s232_s5, 1  ;;  %s243_s10 = scalar_lea.sflag [#allocation5], %s232_s5 }
  0x1f   : > { %s246_s12 = scalar_lea.vmem [#allocation4], %s617_s9 }
  0x20   : > { %789 = dma.done.wait (%p886_p7), %s243_s10, 32  }
  0x21   : > { %791 = vsyncadd (%p886_p7), %s243_s10, 4294967264  ;;  %v308_v0 = vlaneseq  ;;  %v307_v2 = vld [vmem:[%s246_s12] sm:$0x3]  ;;  %v306_v3 = vld [vmem:[%s236_s8] sm:$0xff]  ;;  %v816_v6 = vmov 0.0   ;;  %vm327_vm3 = vcmask 1043456  }
  0x22   : > { %v310_v4 = vperm.slane %v307_v2, 0  ;;  %v311_v5 = vperm.slane %v307_v2, 1  ;;  %322 = vst [vmem:[#allocation1] ss:$2 sm:$0xff] %v306_v3  ;;  %vm314_vm0 = vcmp.ne.s32.totalorder %v307_v2, 255  ;;  %p286_p13 = scmp.lt.s32.totalorder %s806_s18, 1 }
  0x23   : > { %v309_v1 = vshrl.u32 %v308_v0, 7  ;;  %v925_v7 = vsel %vm314_vm0, 1.0, %v816_v6  ;;  %vm302_vm4 = vcmask 3072  }
  0x24   : > { %v416_v8 = vperm.slane %v925_v7, 0  ;;  %v417_v11 = vperm.slane %v925_v7, 1  ;;  %s1018_s18 = smov (!%p286_p13, %s806_s18), 1  ;;  %v817_v7 = vmov 0  }
  0x25   : > { %vm312_vm1 = vcmp.eq.s32.totalorder %v309_v1, %v310_v4  ;;  %vm313_vm2 = vcmp.eq.s32.totalorder %v309_v1, %v311_v5  ;;  %s618_s26 = sshll.u32 %s1018_s18, 2 }
  0x26   : > { %v929_v9 = vsel %vm312_vm1, 1.0, %v816_v6  ;;  %v932_v10 = vsel %vm313_vm2, 1.0, %v816_v6  ;;  %s289_s13 = scalar_lea.vmem %s1004_s2, %s618_s26  ;;  %s297_s21 = scalar_lea.vmem %s1006_s4, %s618_s26 }
  0x27   : > { %v405_v12 = vsel %vm327_vm3, %v929_v9, 0.0  ;;  %v406_v13 = vsel %vm327_vm3, %v932_v10, 0.0  ;;  %v434_v14 = vmul.f32 %v929_v9, %v416_v8  ;;  %v435_v16 = vmul.f32 %v932_v10, %v417_v11  ;;  %s293_s24 = scalar_lea.vmem %s1005_s3, %s618_s26  ;;  %303 = vst.msk [vmem:[%s289_s13] sm:$0xf] %vm302_vm4, %v817_v7 }
  0x28   : > { %v407_v15 = vadd.f32 %v406_v13, %v405_v12  ;;  %v378_v40 = vrot.slane %v932_v10, 4  ;;  %305 = vst.msk [vmem:[%s297_s21] sm:$0xf] %vm302_vm4, %v816_v6 }
  0x29   : > { %v436_v17 = vsel %vm327_vm3, %v434_v14, 0.0  ;;  %v437_v18 = vsel %vm327_vm3, %v435_v16, 0.0  ;;  %v323_v19 = vld.sshfl [vmem:[#allocation1] sm:$0xff pattern:$0x75316420] }
  0x2a   : > { %408 = vadd.xlane.f32.xlu0 %v407_v15  ;;  %v438_v20 = vadd.f32 %v437_v18, %v436_v17  ;;  %v324_v21 = vld.sshfl [vmem:[#allocation1 + $0x8] sm:$0xff pattern:$0x75316420]  ;;  %v328_v22 = vsel %vm327_vm3, %v323_v19, -inf  ;;  %v379_v42 = vsel %vm327_vm3, %v929_v9, %v378_v40  ;;  %304 = vst.msk [vmem:[%s293_s24] sm:$0xf] %vm302_vm4, %v816_v6 }
  0x2b   : > { %v329_v23 = vrot.slane %v328_v22, 4  ;;  %v335_v24 = vsel %vm327_vm3, %v324_v21, -inf  ;;  %v381_v43 = vmul.f32 %v379_v42, %v306_v3 }
  0x2c   : > { %439 = vadd.xlane.f32.xlu1 %v438_v20  ;;  %v336_v25 = vrot.slane %v335_v24, 4 }
  0x2d   : > { %v330_v26 = vmax.f32 %v328_v22, %v329_v23 }
  0x2e   : > { %v337_v27 = vmax.f32 %v335_v24, %v336_v25 }
  0x2f   : > { %v331_v28 = vrot.slane %v330_v26, 2 }
  0x30   : > { %v338_v29 = vrot.slane %v337_v27, 2 }
  0x31   : > { %v332_v30 = vmax.f32 %v330_v26, %v331_v28 }
  0x32   : > { %v339_v31 = vmax.f32 %v337_v27, %v338_v29 }
  0x33   : > { %v333_v32 = vrot.slane %v332_v30, 1 }
  0x34   : > { %v340_v33 = vrot.slane %v339_v31, 1 }
  0x35   : > { %v334_v34 = vmax.f32 %v332_v30, %v333_v32 }
  0x36   : > { %v341_v35 = vmax.f32 %v339_v31, %v340_v33 }
  0x38   : > { %v344_v36 = vrot.slane %v341_v35, 4 }
  0x3a   : > { %v345_v37 = vsel %vm327_vm3, %v334_v34, %v344_v36 }
  0x3b   : > { %v347_v38 = vsub.f32 %v306_v3, %v345_v37  ;;  %v404_v37 = vld [vmem:[%s289_s13] sm:$0xf] }
  0x3d   : > { %v348_v39 = vmul.f32 1.442695, %v347_v38 }
  0x3f   : > { %694 = vpow2.f32 %v348_v39 }
  0x45   : > { %v695_v41 = vpop.eup %694 }
  0x46   : > { %351 = vst [vmem:[#allocation1] ss:$2 sm:$0xff] %v695_v41  ;;  %v414_v41 = vld [vmem:[%s293_s24] sm:$0xf] }
  0x4d   : > { %v352_v44 = vld.sshfl [vmem:[#allocation1] sm:$0xff pattern:$0x75316420]  ;;  %v353_v45 = vld.sshfl [vmem:[#allocation1 + $0x8] sm:$0xff pattern:$0x75316420] }
  0x4e   : > { %v356_v46 = vsel %vm327_vm3, %v352_v44, 0.0  ;;  %v363_v47 = vsel %vm327_vm3, %v353_v45, 0.0  ;;  %383 = vst [vmem:[#allocation1] ss:$2 sm:$0xff] %v381_v43 }
  0x4f   : > { %v357_v48 = vrot.slane %v356_v46, 4  ;;  %v364_v49 = vrot.slane %v363_v47, 4 }
  0x51   : > { %v358_v50 = vadd.f32 %v357_v48, %v356_v46  ;;  %v365_v51 = vadd.f32 %v364_v49, %v363_v47 }
  0x53   : > { %v359_v52 = vrot.slane %v358_v50, 2  ;;  %v366_v53 = vrot.slane %v365_v51, 2 }
  0x55   : > { %v360_v54 = vadd.f32 %v359_v52, %v358_v50  ;;  %v367_v55 = vadd.f32 %v366_v53, %v365_v51  ;;  %v384_v56 = vld.sshfl [vmem:[#allocation1] sm:$0xff pattern:$0x75316420]  ;;  %v385_v57 = vld.sshfl [vmem:[#allocation1 + $0x8] sm:$0xff pattern:$0x75316420] }
  0x56   : > { %v388_v58 = vsel %vm327_vm3, %v384_v56, 0.0  ;;  %v395_v59 = vsel %vm327_vm3, %v385_v57, 0.0 }
  0x57   : > { %v361_v60 = vrot.slane %v360_v54, 1  ;;  %v368_v61 = vrot.slane %v367_v55, 1  ;;  %v389_v62 = vrot.slane %v388_v58, 4  ;;  %v396_v63 = vrot.slane %v395_v59, 4 }
  0x59   : > { %v362_v0 = vadd.f32 %v361_v60, %v360_v54  ;;  %v369_v1 = vadd.f32 %v368_v61, %v367_v55  ;;  %v390_v2 = vadd.f32 %v389_v62, %v388_v58  ;;  %v397_v3 = vadd.f32 %v396_v63, %v395_v59 }
  0x5b   : > { %696 = vlog2.f32 %v362_v0  ;;  %v391_v4 = vrot.slane %v390_v2, 2  ;;  %v398_v5 = vrot.slane %v397_v3, 2 }
  0x5c   : > { %698 = vlog2.f32 %v369_v1 }
  0x5d   : > { %v392_v12 = vadd.f32 %v391_v4, %v390_v2  ;;  %v399_v13 = vadd.f32 %v398_v5, %v397_v3 }
  0x5f   : > { %v393_v14 = vrot.slane %v392_v12, 1  ;;  %v400_v15 = vrot.slane %v399_v13, 1 }
  0x61   : > { %v697_v16 = vpop.eup %696  ;;  %v394_v19 = vadd.f32 %v393_v14, %v392_v12  ;;  %v401_v21 = vadd.f32 %v400_v15, %v399_v13 }
  0x62   : > { %v699_v17 = vpop.eup %698  ;;  %v371_v18 = vmul.f32 0.6931472, %v697_v16 }
  0x63   : > { %v373_v20 = vmul.f32 0.6931472, %v699_v17 }
  0x64   : > { %v374_v22 = vadd.f32 %v371_v18, %v334_v34 }
  0x65   : > { %v375_v23 = vadd.f32 %v373_v20, %v341_v35 }
  0x66   : > { %v402_v24 = vsub.f32 %v374_v22, %v394_v19 }
  0x67   : > { %v403_v25 = vsub.f32 %v375_v23, %v401_v21 }
  0x68   : > { %v420_v26 = vmul.f32 %v416_v8, %v402_v24 }
  0x69   : > { %v421_v27 = vmul.f32 %v417_v11, %v403_v25  ;;  %v433_v11 = vld [vmem:[%s297_s21] sm:$0xf] }
  0x6a   : > { %v422_v28 = vperm.slane %v420_v26, 0 }
  0x6b   : > { %v423_v29 = vperm.slane %v421_v27, 0 }
  0x6c   : > { %v424_v30 = vmul.f32 %v929_v9, %v422_v28 }
  0x6d   : > { %v425_v31 = vmul.f32 %v932_v10, %v423_v29 }
  0x6e   : > { %v426_v32 = vsel %vm327_vm3, %v424_v30, 0.0 }
  0x6f   : > { %v427_v33 = vsel %vm327_vm3, %v425_v31, 0.0 }
  0x70   : > { %v428_v34 = vadd.f32 %v427_v33, %v426_v32 }
  0x72   : > { %429 = vadd.xlane.f32.xlu0 %v428_v34 }
  0x9d   : > { %v409_v8 = vpop.xlane.xlu0 %408 }
  0x9e   : > { %vm627_vm5 = vcmp.lt.s32.totalorder %v409_v8, 0  ;;  %v628_v9 = vceil.f32 %v409_v8  ;;  %v629_v10 = vfloor.f32 %v409_v8 }
  0x9f   : > { %v440_v36 = vpop.xlane.xlu1 %439 }
  0xa0   : > { %v630_v35 = vsel %vm627_vm5, %v628_v9, %v629_v10  ;;  %v441_v39 = vadd.f32 %v440_v36, %v433_v11 }
  0xa1   : > { %v631_v38 = vcvt.f32.s32 %v630_v35 }
  0xa2   : > { %442 = vst.msk [vmem:[%s297_s21] sm:$0xf] %vm302_vm4, %v441_v39 }
  0xa3   : > { %v411_v40 = vadd.s32 %v631_v38, %v404_v37 }
  0xa5   : > { %413 = vst.msk [vmem:[%s289_s13] sm:$0xf] %vm302_vm4, %v411_v40 }
  0xe5   : > { %v430_v42 = vpop.xlane.xlu0 %429 }
  0xe6   : > { %v431_v43 = vadd.f32 %v430_v42, %v414_v41 }
  0xe8   : > { %432 = vst.msk [vmem:[%s293_s24] sm:$0xf] %vm302_vm4, %v431_v43 }
  0xe9 PF: > { %s21_s20 = sadd.s32 1, %s814_s20   ;;  %s1010_s15 = smov %s798_s16 }
  0xea   : > { %p18_p0 = scmp.ge.s32.totalorder %s21_s20, 4   ;;  %s1011_s16 = smov %s802_s17 }
  0xeb   : > { %s1012_s17 = smov %s892_s27  ;;  %s1013_s18 = smov %s810_s19 }
  0xec   : > { %s1014_s19 = smov %s1016_s22  ;;  %20 = sbr.rel (!%p18_p0) target bundleno = 6 (0x6), region = 109 }
  0xf1   :  { %490 = vsyncpa [#allocation3], 1 }
  0xf2   :  { %492 = vsyncpa [#allocation3 + $0x1], 1 }
  0xf3   :  { %493 = vsyncpa [#allocation5], 1 }
  0xf4   :  { %495 = vsyncpa [#allocation5 + $0x1], 1 }

</bundles_post_ra>
